<compile_context>
chip_gen: v6e
topology: v6e:2x2x1
jax: 0.10.0
libtpu: 0.0.40
codegen_flags: <defaults>
</compile_context>

<pallas_src>
import jax
import jax.numpy as jnp
import numpy as np
from jax import lax
from jax.experimental import pallas as pl
from jax.experimental.pallas import tpu as pltpu

H = 16          # args.cnn_hidden_size
C2 = 2 * H      # block input/output channels = 32
L = 35          # args.gen_max_len
B = 2
KTAPS = 8       # surviving (causal) taps of the masked k=17 conv
EPS = 1e-12     # args.layer_norm_eps

SEG = 64        # lane offset of batch 1 inside the working slab
SLAB = 128      # working slab width = one full lane tile
# Layout invariants for the roll-based causal shift (gap lanes must be >= KTAPS).
assert B == 2 and SEG >= L + KTAPS and SLAB - (SEG + L) >= KTAPS


def _layer_norm_cm(v, gamma, beta):
    """LayerNorm over the channel (sublane) axis; gamma/beta are (C, 1)."""
    mu = jnp.mean(v, axis=0, keepdims=True)
    var = jnp.mean((v - mu) ** 2, axis=0, keepdims=True)
    return (v - mu) * lax.rsqrt(var + EPS) * gamma + beta


def bytenet_block_kernel(x_ref, vmask_ref,
                         g1_ref, be1_ref,          # LayerNorm over 32 channels
                         w1_ref, b1_ref,           # conv_1: (16, 32), (16, 1)
                         g2_ref, be2_ref,          # LayerNorm over 16 channels
                         w2s_ref, b2_ref,          # conv_2 stacked: (16, 128), (16, 1)
                         g3_ref, be3_ref,          # LayerNorm over 16 channels
                         w3_ref, b3_ref,           # conv_3: (32, 16), (32, 1)
                         o_ref):
    zeros_gap = jnp.zeros((C2, SEG - L), jnp.float32)            # (32, 29)

    # One channel-major (32, 128) slab holding BOTH batch elements
    # (batch 0 at lanes [0, 35), batch 1 at lanes [64, 99), zeros elsewhere).
    x = jnp.concatenate([x_ref[0], zeros_gap, x_ref[1], zeros_gap], axis=1)

    # --- transpose_norm_1 + ReLU_1 + conv_1 (1x1): (16,32)@(32,128) ---
    h = jnp.maximum(_layer_norm_cm(x, g1_ref[...], be1_ref[...]), 0.0)
    h = jnp.dot(w1_ref[...], h, preferred_element_type=jnp.float32) + b1_ref[...]

    # --- transpose_norm_2 + ReLU_2 ---
    h = jnp.maximum(_layer_norm_cm(h, g2_ref[...], be2_ref[...]), 0.0)
    h = h * vmask_ref[...]      # re-zero gap lanes -> rolls give causal zero fill

    # --- pad(8,8) + MaskedConv1d('A', k=17) == strictly causal 8-tap conv.
    #     Each tap is one XLU lane rotation of the full 128-lane slab (the zero
    #     gap lanes provide the causal padding); the 8 copies are stacked on
    #     the sublane axis (offsets 0,16,...,112 -- tile aligned) and reduced
    #     in a single (16,128)@(128,128) MXU pass.
    stacked = jnp.concatenate(
        [pltpu.roll(h, shift=s, axis=1) for s in range(1, KTAPS + 1)],
        axis=0)                                                   # (128, 128)
    h = jnp.dot(w2s_ref[...], stacked,
                preferred_element_type=jnp.float32) + b2_ref[...]  # (16, 128)

    # --- transpose_norm_3 + ReLU_3 + conv_3 (1x1): (32,16)@(16,128) ---
    h = jnp.maximum(_layer_norm_cm(h, g3_ref[...], be3_ref[...]), 0.0)
    h = jnp.dot(w3_ref[...], h, preferred_element_type=jnp.float32) + b3_ref[...]

    # --- residual add + per-batch store, already in the output's (C, L) layout.
    out = h + x                                                   # (32, 128)
    o_ref[0] = out[:, 0:L]
    o_ref[1] = out[:, SEG:SEG + L]


_PARAM_ORDER = ("vmask", "g1", "be1", "w1", "b1", "g2", "be2",
                "w2s", "b2", "g3", "be3", "w3", "b3")


def bytenet_block(x_ncl, params):
    """x_ncl: (B, 32, L) float32 (PyTorch NCL layout). Returns (B, 32, L)."""
    operands = (x_ncl,) + tuple(params[k] for k in _PARAM_ORDER)
    # Whole problem (< 60 KB) fits in VMEM: no grid, no tiling — every operand
    # is mapped in full with explicit VMEM placement and the kernel runs once.
    vmem = pl.BlockSpec(memory_space=pltpu.MemorySpace.VMEM)
    return pl.pallas_call(
        bytenet_block_kernel,
        out_shape=jax.ShapeDtypeStruct(x_ncl.shape, jnp.float32),
        in_specs=[vmem] * len(operands),
        out_specs=vmem,
    )(*operands)


def make_params(key):
    ks = jax.random.split(key, 12)
    # LayerNorm affine params, stored channel-major as (C, 1).
    g1 = (1.0 + 0.1 * jax.random.normal(ks[0], (C2,))).reshape(C2, 1)
    be1 = (0.1 * jax.random.normal(ks[1], (C2,))).reshape(C2, 1)
    g2 = (1.0 + 0.1 * jax.random.normal(ks[2], (H,))).reshape(H, 1)
    be2 = (0.1 * jax.random.normal(ks[3], (H,))).reshape(H, 1)
    g3 = (1.0 + 0.1 * jax.random.normal(ks[4], (H,))).reshape(H, 1)
    be3 = (0.1 * jax.random.normal(ks[5], (H,))).reshape(H, 1)
    # conv_1: Conv1d(32 -> 16, k=1); native PyTorch weight (16, 32, 1) -> (16, 32).
    w1 = 0.2 * jax.random.normal(ks[6], (H, C2, 1))[:, :, 0]
    b1 = (0.1 * jax.random.normal(ks[7], (H,))).reshape(H, 1)
    # conv_2: MaskedConv1d('A', 16 -> 16, k=17); the mask zeroes taps j >= 8, so
    # only taps j = 0..7 survive.  Tap j pairs with causal shift s = 8 - j; the 8
    # surviving (out, in) tap matrices are stacked along the contraction axis
    # -> (16, 8*16) = (16, 128), matching the in-kernel sublane-stacked taps.
    w2_full = 0.2 * jax.random.normal(ks[8], (H, H, 17))
    w2s = jnp.concatenate(
        [w2_full[:, :, KTAPS - s] for s in range(1, KTAPS + 1)], axis=1)
    b2 = (0.1 * jax.random.normal(ks[9], (H,))).reshape(H, 1)
    # conv_3: Conv1d(16 -> 32, k=1); native weight (32, 16, 1) -> (32, 16).
    w3 = 0.2 * jax.random.normal(ks[10], (C2, H, 1))[:, :, 0]
    b3 = (0.1 * jax.random.normal(ks[11], (C2,))).reshape(C2, 1)
    # Lane-validity mask of the (C, 128) working slab (layout constant, not learnable).
    vm = np.zeros((1, SLAB), np.float32)
    vm[0, 0:L] = 1.0
    vm[0, SEG:SEG + L] = 1.0
    return dict(vmask=jnp.asarray(vm),
                g1=g1, be1=be1, w1=w1, b1=b1, g2=g2, be2=be2,
                w2s=w2s, b2=b2, g3=g3, be3=be3, w3=w3, b3=b3)


def _layer_norm_ref(v, gamma, beta):
    mu = jnp.mean(v, axis=-1, keepdims=True)
    var = jnp.mean((v - mu) ** 2, axis=-1, keepdims=True)
    return (v - mu) * lax.rsqrt(var + EPS) * gamma + beta


def reference(x_ncl, p):
    """Pure-JAX reference of ByteNetBlock.forward (batched, NLC internally)."""
    x = jnp.transpose(x_ncl, (0, 2, 1))                       # (B, L, 32)
    y = x
    h = jnp.maximum(_layer_norm_ref(x, p["g1"][:, 0], p["be1"][:, 0]), 0.0)
    h = h @ p["w1"].T + p["b1"][:, 0]
    h = jnp.maximum(_layer_norm_ref(h, p["g2"][:, 0], p["be2"][:, 0]), 0.0)
    w2t = p["w2s"].reshape(H, KTAPS, H)                       # [c_out, s-1, c_in]
    acc = jnp.zeros((x.shape[0], L, H)) + p["b2"][:, 0]
    h_pad = jnp.pad(h, ((0, 0), (KTAPS, 0), (0, 0)))
    for s in range(1, KTAPS + 1):
        acc = acc + h_pad[:, KTAPS - s:KTAPS - s + L, :] @ w2t[:, s - 1, :].T
    h = jnp.maximum(_layer_norm_ref(acc, p["g3"][:, 0], p["be3"][:, 0]), 0.0)
    h = h @ p["w3"].T + p["b3"][:, 0]
    return jnp.transpose(h + y, (0, 2, 1))


if __name__ == "__main__":
    key = jax.random.PRNGKey(0)
    kx, kp = jax.random.split(key)
    x = jax.random.normal(kx, (B, C2, L), dtype=jnp.float32)   # NCL, like PyTorch
    params = make_params(kp)

    out = jax.block_until_ready(bytenet_block(x, params))
    ref = jax.block_until_ready(reference(x, params))

    assert out.shape == (B, C2, L), out.shape
    if not np.allclose(np.asarray(out), np.asarray(ref), rtol=2e-3, atol=2e-3):
        raise AssertionError("Pallas kernel mismatch vs JAX reference")
    print("KERNEL_OK")
</pallas_src>

<mosaic_0001>
module attributes {stable_mosaic.version = 11 : i64} {
  func.func @bytenet_block_kernel(%arg0: memref<2x32x35xf32, #tpu.memory_space<vmem>>, %arg1: memref<1x128xf32, #tpu.memory_space<vmem>>, %arg2: memref<32x1xf32, #tpu.memory_space<vmem>>, %arg3: memref<32x1xf32, #tpu.memory_space<vmem>>, %arg4: memref<16x32xf32, #tpu.memory_space<vmem>>, %arg5: memref<16x1xf32, #tpu.memory_space<vmem>>, %arg6: memref<16x1xf32, #tpu.memory_space<vmem>>, %arg7: memref<16x1xf32, #tpu.memory_space<vmem>>, %arg8: memref<16x128xf32, #tpu.memory_space<vmem>>, %arg9: memref<16x1xf32, #tpu.memory_space<vmem>>, %arg10: memref<16x1xf32, #tpu.memory_space<vmem>>, %arg11: memref<16x1xf32, #tpu.memory_space<vmem>>, %arg12: memref<32x16xf32, #tpu.memory_space<vmem>>, %arg13: memref<32x1xf32, #tpu.memory_space<vmem>>, %arg14: memref<2x32x35xf32, #tpu.memory_space<vmem>>) attributes {dimension_semantics = [], scalar_prefetch = 0 : i64, scratch_operands = 0 : i64, tpu.core_type = #tpu.core_type<tc>} {
    %cst = arith.constant 0.000000e+00 : f32
    %0 = vector.broadcast %cst : f32 to vector<32x29xf32>
    %c0 = arith.constant 0 : index
    %c0_0 = arith.constant 0 : index
    %c0_1 = arith.constant 0 : index
    %1 = vector.load %arg0[%c0, %c0_0, %c0_1] : memref<2x32x35xf32, #tpu.memory_space<vmem>>, vector<1x32x35xf32>
    %2 = vector.shape_cast %1 : vector<1x32x35xf32> to vector<32x35xf32>
    %c1 = arith.constant 1 : index
    %c0_2 = arith.constant 0 : index
    %c0_3 = arith.constant 0 : index
    %3 = vector.load %arg0[%c1, %c0_2, %c0_3] : memref<2x32x35xf32, #tpu.memory_space<vmem>>, vector<1x32x35xf32>
    %4 = vector.shape_cast %3 : vector<1x32x35xf32> to vector<32x35xf32>
    %5 = tpu.concatenate %2, %0, %4, %0 in 1 : vector<32x35xf32>, vector<32x29xf32>, vector<32x35xf32>, vector<32x29xf32> -> vector<32x128xf32>
    %c0_4 = arith.constant 0 : index
    %c0_5 = arith.constant 0 : index
    %6 = vector.load %arg2[%c0_4, %c0_5] : memref<32x1xf32, #tpu.memory_space<vmem>>, vector<32x1xf32>
    %c0_6 = arith.constant 0 : index
    %c0_7 = arith.constant 0 : index
    %7 = vector.load %arg3[%c0_6, %c0_7] : memref<32x1xf32, #tpu.memory_space<vmem>>, vector<32x1xf32>
    %cst_8 = arith.constant dense<0.000000e+00> : vector<128xf32>
    %8 = vector.multi_reduction <add>, %5, %cst_8 [0] : vector<32x128xf32> to vector<128xf32>
    %9 = vector.shape_cast %8 : vector<128xf32> to vector<1x128xf32>
    %cst_9 = arith.constant 3.200000e+01 : f32
    %10 = vector.broadcast %cst_9 : f32 to vector<1x128xf32>
    %11 = arith.divf %9, %10 : vector<1x128xf32>
    %12 = vector.broadcast %11 : vector<1x128xf32> to vector<32x128xf32>
    %13 = arith.subf %5, %12 : vector<32x128xf32>
    %14 = arith.mulf %13, %13 : vector<32x128xf32>
    %cst_10 = arith.constant dense<0.000000e+00> : vector<128xf32>
    %15 = vector.multi_reduction <add>, %14, %cst_10 [0] : vector<32x128xf32> to vector<128xf32>
    %16 = vector.shape_cast %15 : vector<128xf32> to vector<1x128xf32>
    %cst_11 = arith.constant 3.200000e+01 : f32
    %17 = vector.broadcast %cst_11 : f32 to vector<1x128xf32>
    %18 = arith.divf %16, %17 : vector<1x128xf32>
    %19 = vector.broadcast %11 : vector<1x128xf32> to vector<32x128xf32>
    %20 = arith.subf %5, %19 : vector<32x128xf32>
    %cst_12 = arith.constant 9.99999996E-13 : f32
    %21 = vector.broadcast %cst_12 : f32 to vector<1x128xf32>
    %22 = arith.addf %18, %21 : vector<1x128xf32>
    %23 = math.rsqrt %22 : vector<1x128xf32>
    %24 = vector.broadcast %23 : vector<1x128xf32> to vector<32x128xf32>
    %25 = arith.mulf %20, %24 : vector<32x128xf32>
    %26 = vector.broadcast %6 : vector<32x1xf32> to vector<32x128xf32>
    %27 = arith.mulf %25, %26 : vector<32x128xf32>
    %28 = vector.broadcast %7 : vector<32x1xf32> to vector<32x128xf32>
    %29 = arith.addf %27, %28 : vector<32x128xf32>
    %cst_13 = arith.constant 0.000000e+00 : f32
    %30 = vector.broadcast %cst_13 : f32 to vector<32x128xf32>
    %31 = arith.maximumf %29, %30 : vector<32x128xf32>
    %c0_14 = arith.constant 0 : index
    %c0_15 = arith.constant 0 : index
    %32 = vector.load %arg4[%c0_14, %c0_15] : memref<16x32xf32, #tpu.memory_space<vmem>>, vector<16x32xf32>
    %cst_16 = arith.constant dense<0.000000e+00> : vector<16x128xf32>
    %33 = tpu.matmul %32, %31, %cst_16 {dimension_numbers = #tpu.dot_dimension_numbers<[1], [0], [0], [1], [0, 0, 1, 1], [], []>} : vector<16x32xf32>, vector<32x128xf32>, vector<16x128xf32> -> vector<16x128xf32>
    %c0_17 = arith.constant 0 : index
    %c0_18 = arith.constant 0 : index
    %34 = vector.load %arg5[%c0_17, %c0_18] : memref<16x1xf32, #tpu.memory_space<vmem>>, vector<16x1xf32>
    %35 = vector.broadcast %34 : vector<16x1xf32> to vector<16x128xf32>
    %36 = arith.addf %33, %35 : vector<16x128xf32>
    %c0_19 = arith.constant 0 : index
    %c0_20 = arith.constant 0 : index
    %37 = vector.load %arg6[%c0_19, %c0_20] : memref<16x1xf32, #tpu.memory_space<vmem>>, vector<16x1xf32>
    %c0_21 = arith.constant 0 : index
    %c0_22 = arith.constant 0 : index
    %38 = vector.load %arg7[%c0_21, %c0_22] : memref<16x1xf32, #tpu.memory_space<vmem>>, vector<16x1xf32>
    %cst_23 = arith.constant dense<0.000000e+00> : vector<128xf32>
    %39 = vector.multi_reduction <add>, %36, %cst_23 [0] : vector<16x128xf32> to vector<128xf32>
    %40 = vector.shape_cast %39 : vector<128xf32> to vector<1x128xf32>
    %cst_24 = arith.constant 1.600000e+01 : f32
    %41 = vector.broadcast %cst_24 : f32 to vector<1x128xf32>
    %42 = arith.divf %40, %41 : vector<1x128xf32>
    %43 = vector.broadcast %42 : vector<1x128xf32> to vector<16x128xf32>
    %44 = arith.subf %36, %43 : vector<16x128xf32>
    %45 = arith.mulf %44, %44 : vector<16x128xf32>
    %cst_25 = arith.constant dense<0.000000e+00> : vector<128xf32>
    %46 = vector.multi_reduction <add>, %45, %cst_25 [0] : vector<16x128xf32> to vector<128xf32>
    %47 = vector.shape_cast %46 : vector<128xf32> to vector<1x128xf32>
    %cst_26 = arith.constant 1.600000e+01 : f32
    %48 = vector.broadcast %cst_26 : f32 to vector<1x128xf32>
    %49 = arith.divf %47, %48 : vector<1x128xf32>
    %50 = vector.broadcast %42 : vector<1x128xf32> to vector<16x128xf32>
    %51 = arith.subf %36, %50 : vector<16x128xf32>
    %cst_27 = arith.constant 9.99999996E-13 : f32
    %52 = vector.broadcast %cst_27 : f32 to vector<1x128xf32>
    %53 = arith.addf %49, %52 : vector<1x128xf32>
    %54 = math.rsqrt %53 : vector<1x128xf32>
    %55 = vector.broadcast %54 : vector<1x128xf32> to vector<16x128xf32>
    %56 = arith.mulf %51, %55 : vector<16x128xf32>
    %57 = vector.broadcast %37 : vector<16x1xf32> to vector<16x128xf32>
    %58 = arith.mulf %56, %57 : vector<16x128xf32>
    %59 = vector.broadcast %38 : vector<16x1xf32> to vector<16x128xf32>
    %60 = arith.addf %58, %59 : vector<16x128xf32>
    %cst_28 = arith.constant 0.000000e+00 : f32
    %61 = vector.broadcast %cst_28 : f32 to vector<16x128xf32>
    %62 = arith.maximumf %60, %61 : vector<16x128xf32>
    %c0_29 = arith.constant 0 : index
    %c0_30 = arith.constant 0 : index
    %63 = vector.load %arg1[%c0_29, %c0_30] : memref<1x128xf32, #tpu.memory_space<vmem>>, vector<1x128xf32>
    %64 = vector.broadcast %63 : vector<1x128xf32> to vector<16x128xf32>
    %65 = arith.mulf %62, %64 : vector<16x128xf32>
    %c1_i32 = arith.constant 1 : i32
    %66 = tpu.dynamic_rotate %65 by %c1_i32 dim 1 : vector<16x128xf32>, i32 -> vector<16x128xf32>
    %c2_i32 = arith.constant 2 : i32
    %67 = tpu.dynamic_rotate %65 by %c2_i32 dim 1 : vector<16x128xf32>, i32 -> vector<16x128xf32>
    %c3_i32 = arith.constant 3 : i32
    %68 = tpu.dynamic_rotate %65 by %c3_i32 dim 1 : vector<16x128xf32>, i32 -> vector<16x128xf32>
    %c4_i32 = arith.constant 4 : i32
    %69 = tpu.dynamic_rotate %65 by %c4_i32 dim 1 : vector<16x128xf32>, i32 -> vector<16x128xf32>
    %c5_i32 = arith.constant 5 : i32
    %70 = tpu.dynamic_rotate %65 by %c5_i32 dim 1 : vector<16x128xf32>, i32 -> vector<16x128xf32>
    %c6_i32 = arith.constant 6 : i32
    %71 = tpu.dynamic_rotate %65 by %c6_i32 dim 1 : vector<16x128xf32>, i32 -> vector<16x128xf32>
    %c7_i32 = arith.constant 7 : i32
    %72 = tpu.dynamic_rotate %65 by %c7_i32 dim 1 : vector<16x128xf32>, i32 -> vector<16x128xf32>
    %c8_i32 = arith.constant 8 : i32
    %73 = tpu.dynamic_rotate %65 by %c8_i32 dim 1 : vector<16x128xf32>, i32 -> vector<16x128xf32>
    %74 = tpu.concatenate %66, %67, %68, %69, %70, %71, %72, %73 in 0 : vector<16x128xf32>, vector<16x128xf32>, vector<16x128xf32>, vector<16x128xf32>, vector<16x128xf32>, vector<16x128xf32>, vector<16x128xf32>, vector<16x128xf32> -> vector<128x128xf32>
    %c0_31 = arith.constant 0 : index
    %c0_32 = arith.constant 0 : index
    %75 = vector.load %arg8[%c0_31, %c0_32] : memref<16x128xf32, #tpu.memory_space<vmem>>, vector<16x128xf32>
    %cst_33 = arith.constant dense<0.000000e+00> : vector<16x128xf32>
    %76 = tpu.matmul %75, %74, %cst_33 {dimension_numbers = #tpu.dot_dimension_numbers<[1], [0], [0], [1], [0, 0, 1, 1], [], []>} : vector<16x128xf32>, vector<128x128xf32>, vector<16x128xf32> -> vector<16x128xf32>
    %c0_34 = arith.constant 0 : index
    %c0_35 = arith.constant 0 : index
    %77 = vector.load %arg9[%c0_34, %c0_35] : memref<16x1xf32, #tpu.memory_space<vmem>>, vector<16x1xf32>
    %78 = vector.broadcast %77 : vector<16x1xf32> to vector<16x128xf32>
    %79 = arith.addf %76, %78 : vector<16x128xf32>
    %c0_36 = arith.constant 0 : index
    %c0_37 = arith.constant 0 : index
    %80 = vector.load %arg10[%c0_36, %c0_37] : memref<16x1xf32, #tpu.memory_space<vmem>>, vector<16x1xf32>
    %c0_38 = arith.constant 0 : index
    %c0_39 = arith.constant 0 : index
    %81 = vector.load %arg11[%c0_38, %c0_39] : memref<16x1xf32, #tpu.memory_space<vmem>>, vector<16x1xf32>
    %cst_40 = arith.constant dense<0.000000e+00> : vector<128xf32>
    %82 = vector.multi_reduction <add>, %79, %cst_40 [0] : vector<16x128xf32> to vector<128xf32>
    %83 = vector.shape_cast %82 : vector<128xf32> to vector<1x128xf32>
    %cst_41 = arith.constant 1.600000e+01 : f32
    %84 = vector.broadcast %cst_41 : f32 to vector<1x128xf32>
    %85 = arith.divf %83, %84 : vector<1x128xf32>
    %86 = vector.broadcast %85 : vector<1x128xf32> to vector<16x128xf32>
    %87 = arith.subf %79, %86 : vector<16x128xf32>
    %88 = arith.mulf %87, %87 : vector<16x128xf32>
    %cst_42 = arith.constant dense<0.000000e+00> : vector<128xf32>
    %89 = vector.multi_reduction <add>, %88, %cst_42 [0] : vector<16x128xf32> to vector<128xf32>
    %90 = vector.shape_cast %89 : vector<128xf32> to vector<1x128xf32>
    %cst_43 = arith.constant 1.600000e+01 : f32
    %91 = vector.broadcast %cst_43 : f32 to vector<1x128xf32>
    %92 = arith.divf %90, %91 : vector<1x128xf32>
    %93 = vector.broadcast %85 : vector<1x128xf32> to vector<16x128xf32>
    %94 = arith.subf %79, %93 : vector<16x128xf32>
    %cst_44 = arith.constant 9.99999996E-13 : f32
    %95 = vector.broadcast %cst_44 : f32 to vector<1x128xf32>
    %96 = arith.addf %92, %95 : vector<1x128xf32>
    %97 = math.rsqrt %96 : vector<1x128xf32>
    %98 = vector.broadcast %97 : vector<1x128xf32> to vector<16x128xf32>
    %99 = arith.mulf %94, %98 : vector<16x128xf32>
    %100 = vector.broadcast %80 : vector<16x1xf32> to vector<16x128xf32>
    %101 = arith.mulf %99, %100 : vector<16x128xf32>
    %102 = vector.broadcast %81 : vector<16x1xf32> to vector<16x128xf32>
    %103 = arith.addf %101, %102 : vector<16x128xf32>
    %cst_45 = arith.constant 0.000000e+00 : f32
    %104 = vector.broadcast %cst_45 : f32 to vector<16x128xf32>
    %105 = arith.maximumf %103, %104 : vector<16x128xf32>
    %c0_46 = arith.constant 0 : index
    %c0_47 = arith.constant 0 : index
    %106 = vector.load %arg12[%c0_46, %c0_47] : memref<32x16xf32, #tpu.memory_space<vmem>>, vector<32x16xf32>
    %cst_48 = arith.constant dense<0.000000e+00> : vector<32x128xf32>
    %107 = tpu.matmul %106, %105, %cst_48 {dimension_numbers = #tpu.dot_dimension_numbers<[1], [0], [0], [1], [0, 0, 1, 1], [], []>} : vector<32x16xf32>, vector<16x128xf32>, vector<32x128xf32> -> vector<32x128xf32>
    %c0_49 = arith.constant 0 : index
    %c0_50 = arith.constant 0 : index
    %108 = vector.load %arg13[%c0_49, %c0_50] : memref<32x1xf32, #tpu.memory_space<vmem>>, vector<32x1xf32>
    %109 = vector.broadcast %108 : vector<32x1xf32> to vector<32x128xf32>
    %110 = arith.addf %107, %109 : vector<32x128xf32>
    %111 = arith.addf %110, %5 : vector<32x128xf32>
    %112 = vector.extract_strided_slice %111 {offsets = [0, 0], sizes = [32, 35], strides = [1, 1]} : vector<32x128xf32> to vector<32x35xf32>
    %c0_51 = arith.constant 0 : index
    %c0_52 = arith.constant 0 : index
    %c0_53 = arith.constant 0 : index
    %113 = vector.load %arg14[%c0_51, %c0_52, %c0_53] : memref<2x32x35xf32, #tpu.memory_space<vmem>>, vector<1x32x35xf32>
    %114 = vector.shape_cast %113 : vector<1x32x35xf32> to vector<32x35xf32>
    %115 = vector.shape_cast %112 : vector<32x35xf32> to vector<1x32x35xf32>
    tpu.vector_store %arg14[%c0_51, %c0_52, %c0_53], %115 {strides = array<i32>} : memref<2x32x35xf32, #tpu.memory_space<vmem>>, vector<1x32x35xf32>,
    %116 = vector.extract_strided_slice %111 {offsets = [0, 64], sizes = [32, 35], strides = [1, 1]} : vector<32x128xf32> to vector<32x35xf32>
    %c1_54 = arith.constant 1 : index
    %c0_55 = arith.constant 0 : index
    %c0_56 = arith.constant 0 : index
    %117 = vector.load %arg14[%c1_54, %c0_55, %c0_56] : memref<2x32x35xf32, #tpu.memory_space<vmem>>, vector<1x32x35xf32>
    %118 = vector.shape_cast %117 : vector<1x32x35xf32> to vector<32x35xf32>
    %119 = vector.shape_cast %116 : vector<32x35xf32> to vector<1x32x35xf32>
    tpu.vector_store %arg14[%c1_54, %c0_55, %c0_56], %119 {strides = array<i32>} : memref<2x32x35xf32, #tpu.memory_space<vmem>>, vector<1x32x35xf32>,
    return
  }
}

</mosaic_0001>

<bundles_post_ra>
// kernel: tpu_custom_call.1
= control target key start
LH: loop header
LB: loop body
LE: loop exit
PB: predicated region body
PF: predicated region fallthrough
CT: control target
= control target key end

     0   :  { %s828_s17 = smov 64   ;;  %v829_v4 = vmov 0   ;;  %s1090_s0 = inlined_call_operand.vmem [shape: f32[2,32,35], index: 0, kind: input, shape index: {}]   ;;  %s1091_s1 = inlined_call_operand.vmem [shape: f32[1,128], index: 1, kind: input, shape index: {}]   ;;  %s1092_s2 = inlined_call_operand.vmem [shape: f32[32,1], index: 2, kind: input, shape index: {}]   ;;  %s1093_s3 = inlined_call_operand.vmem [shape: f32[32,1], index: 3, kind: input, shape index: {}]   ;;  %s1094_s4 = inlined_call_operand.vmem [shape: f32[16,32], index: 4, kind: input, shape index: {}]   ;;  %s1095_s5 = inlined_call_operand.vmem [shape: f32[16,1], index: 5, kind: input, shape index: {}]   ;;  %s1096_s6 = inlined_call_operand.vmem [shape: f32[16,1], index: 6, kind: input, shape index: {}]   ;;  %s1097_s7 = inlined_call_operand.vmem [shape: f32[16,1], index: 7, kind: input, shape index: {}]   ;;  %s1098_s8 = inlined_call_operand.vmem [shape: f32[16,128], index: 8, kind: input, shape index: {}]   ;;  %s1099_s9 = inlined_call_operand.vmem [shape: f32[16,1], index: 9, kind: input, shape index: {}]   ;;  %s1100_s10 = inlined_call_operand.vmem [shape: f32[16,1], index: 10, kind: input, shape index: {}]   ;;  %s1101_s11 = inlined_call_operand.vmem [shape: f32[16,1], index: 11, kind: input, shape index: {}]   ;;  %s1102_s12 = inlined_call_operand.vmem [shape: f32[32,16], index: 12, kind: input, shape index: {}]   ;;  %s1103_s13 = inlined_call_operand.vmem [shape: f32[32,1], index: 13, kind: input, shape index: {}]   ;;  %s1104_s14 = inlined_call_operand.hbm [shape: f32[2,32,35], index: 14, kind: output, shape index: {}]  }
   0x1   :  { %v689_v0 = vld [vmem:[%s1090_s0 + $0x20] sm:$0xff]  ;;  %v691_v1 = vld [vmem:[%s1090_s0 + $0x30] sm:$0xff]  ;;  %v690_v2 = vld [vmem:[%s1090_s0 + $0x28] sm:$0xff]  ;;  %799 = vset.pattern.permute.xlu1 %v829_v4  ;;  %798 = vset.pattern.permute.xlu0 %v829_v4 }
   0x2   :  { %61 = vrot.lane.b32.xlu0 %v689_v0, %s828_s17  ;;  %65 = vrot.lane.b32.xlu1 %v691_v1, %s828_s17  ;;  %v692_v3 = vld [vmem:[%s1090_s0 + $0x38] sm:$0xff]  ;;  %v90_v5 = vld [vmem:[%s1092_s2 + $0x10] sm:$0xff] }
   0x3   :  { %v91_v6 = vld [vmem:[%s1092_s2 + $0x18] sm:$0xff] }
   0x6   :  { %63 = vrot.lane.b32.xlu0 %v690_v2, %s828_s17  ;;  %67 = vrot.lane.b32.xlu1 %v692_v3, %s828_s17 }
   0x7   :  { %19 = vsyncpa [#allocation3], 0  ;;  %v95_v7 = vld [vmem:[%s1093_s3 + $0x18] sm:$0xff]  ;;  %v89_v8 = vld [vmem:[%s1092_s2 + $0x8] sm:$0xff]  ;;  %vm197_vm0 = vcmask 261120   ;;  %vm73_vm1 = vcmask 285696  }
   0x8   :  { %v94_v9 = vld [vmem:[%s1093_s3 + $0x10] sm:$0xff]  ;;  %v88_v10 = vld [vmem:[%s1092_s2] sm:$0xff]  ;;  %v93_v11 = vld [vmem:[%s1093_s3 + $0x8] sm:$0xff]  ;;  %vm78_vm2 = vcmask 523264   ;;  %vm83_vm3 = vcmask 809984   ;;  %s830_s2 = smov 8  }
   0x9   :  { %v92_v12 = vld [vmem:[%s1093_s3] sm:$0xff]  ;;  %v186_v14 = vld [vmem:[%s1095_s5 + $0x8] sm:$0xff]  ;;  %v50_v21 = vld [vmem:[%s1090_s0 + $0x10] sm:$0xff]  ;;  %s831_s27 = smov 7   ;;  %s832_s28 = smov 6   ;;  %vm546_vm4 = vcmask 130048  }
   0xa   :  { %143 = vperm.xlu1 %799, %v90_v5   ;;  %148 = vperm.xlu0 %798, %v91_v6   ;;  %v185_v13 = vld [vmem:[%s1095_s5] sm:$0xff]  ;;  %v280_v15 = vld [vmem:[%s1096_s6 + $0x8] sm:$0xff]  ;;  %v51_v23 = vld [vmem:[%s1090_s0 + $0x18] sm:$0xff]  ;;  %v76_v27 = vsel %vm73_vm1, %v50_v21, 0.0  ;;  %s833_s29 = smov 5   ;;  %s834_s3 = smov 4  }
   0xb   :  { %v279_v16 = vld [vmem:[%s1096_s6] sm:$0xff]  ;;  %v282_v17 = vld [vmem:[%s1097_s7 + $0x8] sm:$0xff]  ;;  %v77_v29 = vsel %vm73_vm1, %v51_v23, 0.0  ;;  %s835_s15 = smov 3   ;;  %s836_s16 = smov 2  }
   0xc   :  { %v281_v18 = vld [vmem:[%s1097_s7] sm:$0xff]  ;;  %v49_v22 = vld [vmem:[%s1090_s0 + $0x8] sm:$0xff]  ;;  %s837_s5 = smov 1  }
   0xd   :  { %v183_v19 = vld [vmem:[%s1094_s4] sm:$0xff]  ;;  %v75_v28 = vsel %vm73_vm1, %v49_v22, 0.0 }
   0xe   :  { %172 = vperm.xlu1 %799, %v95_v7   ;;  %138 = vperm.xlu0 %798, %v89_v8   ;;  %v48_v20 = vld [vmem:[%s1090_s0] sm:$0xff] }
   0xf   :  { %738 = vmatprep.mubr.msk.f32.mxu0 %vm197_vm0, %v183_v19  ;;  %v74_v25 = vsel %vm73_vm1, %v48_v20, 0.0 }
  0x12   :  { %167 = vperm.xlu1 %799, %v94_v9   ;;  %133 = vperm.xlu0 %798, %v88_v10  }
  0x16   :  { %162 = vperm.xlu1 %799, %v93_v11   ;;  %157 = vperm.xlu0 %798, %v92_v12  }
  0x1a   :  { %189 = vperm.xlu1 %799, %v185_v13   ;;  %194 = vperm.xlu0 %798, %v186_v14  }
  0x1e   :  { %315 = vperm.xlu1 %799, %v280_v15   ;;  %310 = vperm.xlu0 %798, %v279_v16  }
  0x22   :  { %327 = vperm.xlu1 %799, %v282_v17   ;;  %322 = vperm.xlu0 %798, %v281_v18  }
  0x74   :  { %v62_v24 = vpop.permute.xlu0 %61  ;;  %v66_v26 = vpop.permute.xlu1 %65 }
  0x75   :  { %v79_v30 = vsel %vm78_vm2, %v74_v25, %v62_v24  ;;  %v81_v33 = vsel %vm78_vm2, %v76_v27, %v66_v26 }
  0x76   :  { %v993_v36 = vsel %vm83_vm3, %v79_v30, 0.0  ;;  %v999_v39 = vsel %vm83_vm3, %v81_v33, 0.0  ;;  %v184_v30 = vld [vmem:[%s1094_s4 + $0x8] sm:$0xff] }
  0x78   :  { %v64_v31 = vpop.permute.xlu0 %63  ;;  %v68_v32 = vpop.permute.xlu1 %67 }
  0x79   :  { %v80_v34 = vsel %vm78_vm2, %v75_v28, %v64_v31  ;;  %v82_v35 = vsel %vm78_vm2, %v77_v29, %v68_v32 }
  0x7a   :  { %v995_v37 = vsel %vm83_vm3, %v80_v34, 0.0  ;;  %v1001_v40 = vsel %vm83_vm3, %v82_v35, 0.0 }
  0x7b   :  { %v96_v38 = vadd.f32 %v995_v37, %v993_v36 }
  0x7d   :  { %v97_v41 = vadd.f32 %v96_v38, %v999_v39 }
  0x7f   :  { %v98_v42 = vadd.f32 %v97_v41, %v1001_v40 }
  0x81   :  { %v99_v43 = vrot.slane %v98_v42, 4 }
  0x83   :  { %v100_v44 = vadd.f32 %v99_v43, %v98_v42 }
  0x85   :  { %v101_v45 = vrot.slane %v100_v44, 2  ;;  %v144_v5 = vpop.permute.xlu1 %143  ;;  %v149_v6 = vpop.permute.xlu0 %148 }
  0x87   :  { %v102_v46 = vadd.f32 %v101_v45, %v100_v44 }
  0x89   :  { %v103_v47 = vrot.slane %v102_v46, 1  ;;  %v173_v7 = vpop.permute.xlu1 %172  ;;  %v139_v8 = vpop.permute.xlu0 %138 }
  0x8b   :  { %v104_v48 = vadd.f32 %v103_v47, %v102_v46 }
  0x8d   :  { %v106_v49 = vmul.f32 0.03125, %v104_v48  ;;  %v168_v10 = vpop.permute.xlu1 %167  ;;  %v134_v15 = vpop.permute.xlu0 %133 }
  0x8f   :  { %v107_v50 = vsub.f32 %v993_v36, %v106_v49  ;;  %v108_v51 = vsub.f32 %v995_v37, %v106_v49  ;;  %v109_v52 = vsub.f32 %v999_v39, %v106_v49  ;;  %v110_v53 = vsub.f32 %v1001_v40, %v106_v49 }
  0x91   :  { %v111_v54 = vmul.f32 %v107_v50, %v107_v50  ;;  %v112_v55 = vmul.f32 %v108_v51, %v108_v51  ;;  %v113_v56 = vmul.f32 %v109_v52, %v109_v52  ;;  %v114_v58 = vmul.f32 %v110_v53, %v110_v53  ;;  %v163_v22 = vpop.permute.xlu1 %162  ;;  %v158_v25 = vpop.permute.xlu0 %157 }
  0x93   :  { %v115_v57 = vadd.f32 %v112_v55, %v111_v54 }
  0x95   :  { %v116_v59 = vadd.f32 %v115_v57, %v113_v56  ;;  %v190_v32 = vpop.permute.xlu1 %189  ;;  %v195_v33 = vpop.permute.xlu0 %194 }
  0x97   :  { %v117_v60 = vadd.f32 %v116_v59, %v114_v58 }
  0x99   :  { %v118_v61 = vrot.slane %v117_v60, 4 }
  0x9b   :  { %v119_v62 = vadd.f32 %v118_v61, %v117_v60 }
  0x9d   :  { %v120_v63 = vrot.slane %v119_v62, 2 }
  0x9f   :  { %v121_v0 = vadd.f32 %v120_v63, %v119_v62  ;;  %v316_v62 = vpop.permute.xlu1 %315  ;;  %v311_v63 = vpop.permute.xlu0 %310 }
  0xa1   :  { %v122_v1 = vrot.slane %v121_v0, 1 }
  0xa3   :  { %v123_v2 = vadd.f32 %v122_v1, %v121_v0 }
  0xa5   :  { %v124_v3 = vmul.f32 0.03125, %v123_v2 }
  0xa7   :  { %v125_v4 = vadd.f32 1e-12, %v124_v3 }
  0xa9   :  { %800 = vrsqrt.f32 %v125_v4 }
  0xb6   :  { %v801_v9 = vpop.eup %800 }
  0xb7   :  { %v129_v11 = vmul.f32 %v801_v9, %v109_v52  ;;  %v130_v12 = vmul.f32 %v801_v9, %v110_v53  ;;  %v128_v13 = vmul.f32 %v801_v9, %v108_v51  ;;  %v127_v14 = vmul.f32 %v801_v9, %v107_v50  ;;  %v695_v9 = vld [vmem:[%s1091_s1] ss:$0 sm:$0xff] }
  0xb9   :  { %v153_v16 = vmul.f32 %v144_v5, %v129_v11  ;;  %v154_v17 = vmul.f32 %v149_v6, %v130_v12  ;;  %v152_v18 = vmul.f32 %v139_v8, %v128_v13  ;;  %v151_v21 = vmul.f32 %v134_v15, %v127_v14  ;;  %v328_v5 = vpop.permute.xlu1 %327  ;;  %v323_v6 = vpop.permute.xlu0 %322  ;;  %v375_v14 = vld [vmem:[%s1098_s8] sm:$0xff] }
  0xba   :  { %773 = vmatprep.mubr.f32.mxu1 %v375_v14  ;;  %v377_v15 = vld [vmem:[%s1099_s9] sm:$0xff] }
  0xbb   :  { %v178_v19 = vadd.f32 %v173_v7, %v154_v17  ;;  %v177_v20 = vadd.f32 %v168_v10, %v153_v16  ;;  %v176_v24 = vadd.f32 %v163_v22, %v152_v18  ;;  %v175_v27 = vadd.f32 %v158_v25, %v151_v21  ;;  %v378_v16 = vld [vmem:[%s1099_s9 + $0x8] sm:$0xff]  ;;  %v464_v18 = vld [vmem:[%s1100_s10] sm:$0xff] }
  0xbc   :  { %v465_v17 = vld [vmem:[%s1100_s10 + $0x8] sm:$0xff]  ;;  %v522_v21 = vld [vmem:[%s1103_s13] sm:$0xff] }
  0xbd   :  { %v182_v23 = vmax.f32 %v178_v19, 0.0  ;;  %v181_v26 = vmax.f32 %v177_v20, 0.0  ;;  %v180_v28 = vmax.f32 %v176_v24, 0.0  ;;  %v179_v29 = vmax.f32 %v175_v27, 0.0  ;;  %v467_v19 = vld [vmem:[%s1101_s11 + $0x8] sm:$0xff]  ;;  %v466_v20 = vld [vmem:[%s1101_s11] sm:$0xff] }
  0xbe   :  { %v523_v22 = vld [vmem:[%s1103_s13 + $0x8] sm:$0xff]  ;;  %v525_v24 = vld [vmem:[%s1103_s13 + $0x18] sm:$0xff] }
  0xbf   :  { %730 = vmatprep.subr.mxu0 %v182_v23 }
  0xc0   :  { %731 = vmatpush3.msra.mxu0 %v182_v23  ;;  %v524_v23 = vld [vmem:[%s1103_s13 + $0x10] sm:$0xff] }
  0xc1   :  { %732 = vmatprep.subr.mxu0 %v181_v26 }
  0xc2   :  { %733 = vmatpush3.msra.mxu0 %v181_v26 }
  0xc3   :  { %734 = vmatprep.subr.mxu0 %v180_v28 }
  0xc4   :  { %735 = vmatpush3.msra.mxu0 %v180_v28 }
  0xc5   :  { %736 = vmatprep.subr.mxu0 %v179_v29 }
  0xc6   :  { %737 = vmatpush3.msra.mxu0 %v179_v29 }
  0xc7   :  { %739 = vmatmul.mubr.msk.f32.vlgmr.msra.gmra.mxu0 %vm197_vm0, %v184_v30 }
 0x187   :  { %v740_v31 = vpop.f32.mrf.mxu0 }
 0x188   :  { %v276_v35 = vadd.f32 %v740_v31, %v195_v33 }
 0x189   :  { %v270_v34 = vpop.f32.mrf.mxu0 }
 0x18a   :  { %v271_v38 = vadd.f32 %v270_v34, %v190_v32 }
 0x18c   :  { %v283_v41 = vadd.f32 %v276_v35, %v271_v38 }
 0x18e   :  { %v284_v42 = vrot.slane %v283_v41, 4 }
 0x190   :  { %v285_v43 = vadd.f32 %v284_v42, %v283_v41 }
 0x192   :  { %v286_v44 = vrot.slane %v285_v43, 2 }
 0x194   :  { %v287_v45 = vadd.f32 %v286_v44, %v285_v43 }
 0x196   :  { %v288_v46 = vrot.slane %v287_v45, 1 }
 0x198   :  { %v289_v47 = vadd.f32 %v288_v46, %v287_v45  ;;  %v376_v45 = vld [vmem:[%s1098_s8 + $0x8] sm:$0xff]  ;;  %v518_v46 = vld [vmem:[%s1102_s12] sm:$0xff] }
 0x199   :  { %780 = vmatprep.mubr.msk.f32.mxu0 %vm546_vm4, %v518_v46 }
 0x19a   :  { %v291_v48 = vmul.f32 0.0625, %v289_v47 }
 0x19c   :  { %v292_v49 = vsub.f32 %v271_v38, %v291_v48  ;;  %v293_v50 = vsub.f32 %v276_v35, %v291_v48 }
 0x19e   :  { %v294_v51 = vmul.f32 %v292_v49, %v292_v49  ;;  %v295_v52 = vmul.f32 %v293_v50, %v293_v50 }
 0x1a0   :  { %v296_v53 = vadd.f32 %v295_v52, %v294_v51 }
 0x1a2   :  { %v297_v54 = vrot.slane %v296_v53, 4 }
 0x1a4   :  { %v298_v55 = vadd.f32 %v297_v54, %v296_v53 }
 0x1a6   :  { %v299_v56 = vrot.slane %v298_v55, 2 }
 0x1a8   :  { %v300_v57 = vadd.f32 %v299_v56, %v298_v55 }
 0x1aa   :  { %v301_v58 = vrot.slane %v300_v57, 1 }
 0x1ac   :  { %v302_v59 = vadd.f32 %v301_v58, %v300_v57 }
 0x1ae   :  { %v303_v60 = vmul.f32 0.0625, %v302_v59 }
 0x1b0   :  { %v304_v61 = vadd.f32 1e-12, %v303_v60 }
 0x1b2   :  { %802 = vrsqrt.f32 %v304_v61 }
 0x1bf   :  { %v803_v0 = vpop.eup %802 }
 0x1c0   :  { %v306_v1 = vmul.f32 %v803_v0, %v292_v49  ;;  %v307_v2 = vmul.f32 %v803_v0, %v293_v50 }
 0x1c2   :  { %v318_v3 = vmul.f32 %v311_v63, %v306_v1  ;;  %v319_v4 = vmul.f32 %v316_v62, %v307_v2 }
 0x1c4   :  { %v330_v7 = vadd.f32 %v323_v6, %v318_v3  ;;  %v331_v8 = vadd.f32 %v328_v5, %v319_v4 }
 0x1c6   :  { %v332_v10 = vmax.f32 %v330_v7, 0.0  ;;  %v333_v11 = vmax.f32 %v331_v8, 0.0 }
 0x1c8   :  { %v341_v12 = vmul.f32 %v695_v9, %v332_v10  ;;  %v342_v13 = vmul.f32 %v695_v9, %v333_v11 }
 0x1ca   :  { %373 = vrot.lane.b32.xlu1 %v342_v13, %s830_s2  ;;  %371 = vrot.lane.b32.xlu0 %v341_v12, %s830_s2 }
 0x1ce   :  { %369 = vrot.lane.b32.xlu1 %v342_v13, %s831_s27  ;;  %367 = vrot.lane.b32.xlu0 %v341_v12, %s831_s27 }
 0x1d2   :  { %365 = vrot.lane.b32.xlu1 %v342_v13, %s832_s28  ;;  %363 = vrot.lane.b32.xlu0 %v341_v12, %s832_s28 }
 0x1d6   :  { %361 = vrot.lane.b32.xlu1 %v342_v13, %s833_s29  ;;  %359 = vrot.lane.b32.xlu0 %v341_v12, %s833_s29 }
 0x1da   :  { %357 = vrot.lane.b32.xlu1 %v342_v13, %s834_s3  ;;  %355 = vrot.lane.b32.xlu0 %v341_v12, %s834_s3 }
 0x1de   :  { %353 = vrot.lane.b32.xlu1 %v342_v13, %s835_s15  ;;  %351 = vrot.lane.b32.xlu0 %v341_v12, %s835_s15 }
 0x1e2   :  { %349 = vrot.lane.b32.xlu1 %v342_v13, %s836_s16  ;;  %347 = vrot.lane.b32.xlu0 %v341_v12, %s836_s16 }
 0x1e6   :  { %345 = vrot.lane.b32.xlu1 %v342_v13, %s837_s5  ;;  %343 = vrot.lane.b32.xlu0 %v341_v12, %s837_s5 }
 0x1ea   :  { %381 = vperm.xlu1 %799, %v377_v15   ;;  %386 = vperm.xlu0 %798, %v378_v16  }
 0x1ee   :  { %499 = vperm.xlu1 %799, %v465_v17   ;;  %494 = vperm.xlu0 %798, %v464_v18  }
 0x1f2   :  { %511 = vperm.xlu1 %799, %v467_v19   ;;  %506 = vperm.xlu0 %798, %v466_v20  }
 0x1f6   :  { %528 = vperm.xlu1 %799, %v522_v21   ;;  %533 = vperm.xlu0 %798, %v523_v22  }
 0x1fa   :  { %538 = vperm.xlu1 %799, %v524_v23   ;;  %543 = vperm.xlu0 %798, %v525_v24   ;;  %v519_v23 = vld [vmem:[%s1102_s12 + $0x8] sm:$0xff]  ;;  %v520_v24 = vld [vmem:[%s1102_s12 + $0x10] sm:$0xff] }
 0x23c   :  { %v374_v25 = vpop.permute.xlu1 %373  ;;  %v372_v26 = vpop.permute.xlu0 %371 }
 0x23d   :  { %741 = vmatprep.subr.mxu1 %v374_v25 }
 0x23e   :  { %742 = vmatpush3.msra.mxu1 %v374_v25  ;;  %v521_v25 = vld [vmem:[%s1102_s12 + $0x18] sm:$0xff]  ;;  %s838_s12 = smov [#allocation2]  }
 0x23f   :  { %743 = vmatprep.subr.mxu1 %v372_v26  ;;  %s678_s20 = sshll.u32 %s838_s12, 4  ;;  %s679_s20 = int_to_ptr.vmem [resolvable:$true] %s678_s20 }
 0x240   :  { %v370_v27 = vpop.permute.xlu1 %369  ;;  %744 = vmatpush3.msra.mxu1 %v372_v26  ;;  %v368_v28 = vpop.permute.xlu0 %367  ;;  %s806_s21 = scalar_lea.vmem %s679_s20, 1024  ;;  %p811_p1 = scmp.lt.s32.totalorder %s679_s20, %s679_s20 }
 0x241   :  { %745 = vmatprep.subr.mxu1 %v370_v27  ;;  %p807_p0 = scmp.ne.s32.totalorder %s679_s20, %s806_s21  ;;  %p812_p2 = scmp.lt.s32.totalorder %s806_s21, %s806_s21 }
 0x242   :  { %746 = vmatpush3.msra.mxu1 %v370_v27 }
 0x243   :  { %747 = vmatprep.subr.mxu1 %v368_v28  ;;  %p813_p3 = por %p812_p2, %p811_p1 }
 0x244   :  { %v366_v29 = vpop.permute.xlu1 %365  ;;  %748 = vmatpush3.msra.mxu1 %v368_v28  ;;  %v364_v30 = vpop.permute.xlu0 %363 }
 0x245   :  { %749 = vmatprep.subr.mxu1 %v366_v29  ;;  %p814_p4 = pnand %p813_p3, %p807_p0 }
 0x246   :  { %750 = vmatpush3.msra.mxu1 %v366_v29 }
 0x247   :  { %751 = vmatprep.subr.mxu1 %v364_v30 }
 0x248   :  { %v362_v31 = vpop.permute.xlu1 %361  ;;  %752 = vmatpush3.msra.mxu1 %v364_v30  ;;  %v360_v32 = vpop.permute.xlu0 %359 }
 0x249   :  { %753 = vmatprep.subr.mxu1 %v362_v31 }
 0x24a   :  { %754 = vmatpush3.msra.mxu1 %v362_v31 }
 0x24b   :  { %755 = vmatprep.subr.mxu1 %v360_v32 }
 0x24c   :  { %v358_v33 = vpop.permute.xlu1 %357  ;;  %756 = vmatpush3.msra.mxu1 %v360_v32  ;;  %v356_v34 = vpop.permute.xlu0 %355 }
 0x24d   :  { %757 = vmatprep.subr.mxu1 %v358_v33 }
 0x24e   :  { %758 = vmatpush3.msra.mxu1 %v358_v33 }
 0x24f   :  { %759 = vmatprep.subr.mxu1 %v356_v34 }
 0x250   :  { %v354_v35 = vpop.permute.xlu1 %353  ;;  %760 = vmatpush3.msra.mxu1 %v356_v34  ;;  %v352_v38 = vpop.permute.xlu0 %351 }
 0x251   :  { %761 = vmatprep.subr.mxu1 %v354_v35 }
 0x252   :  { %762 = vmatpush3.msra.mxu1 %v354_v35 }
 0x253   :  { %763 = vmatprep.subr.mxu1 %v352_v38 }
 0x254   :  { %v350_v41 = vpop.permute.xlu1 %349  ;;  %764 = vmatpush3.msra.mxu1 %v352_v38  ;;  %v348_v42 = vpop.permute.xlu0 %347 }
 0x255   :  { %765 = vmatprep.subr.mxu1 %v350_v41 }
 0x256   :  { %766 = vmatpush3.msra.mxu1 %v350_v41 }
 0x257   :  { %767 = vmatprep.subr.mxu1 %v348_v42 }
 0x258   :  { %v346_v43 = vpop.permute.xlu1 %345  ;;  %768 = vmatpush3.msra.mxu1 %v348_v42  ;;  %v344_v44 = vpop.permute.xlu0 %343 }
 0x259   :  { %769 = vmatprep.subr.mxu1 %v346_v43 }
 0x25a   :  { %770 = vmatpush3.msra.mxu1 %v346_v43 }
 0x25b   :  { %771 = vmatprep.subr.mxu1 %v344_v44 }
 0x25c   :  { %772 = vmatpush3.msra.mxu1 %v344_v44 }
 0x25d   :  { %774 = vmatmul.mubr.f32.vlgmr.msra.gmra.mxu1 %v376_v45 }
 0x265   :  { %v382_v48 = vpop.permute.xlu1 %381  ;;  %v387_v49 = vpop.permute.xlu0 %386 }
 0x269   :  { %v500_v10 = vpop.permute.xlu1 %499  ;;  %v495_v11 = vpop.permute.xlu0 %494 }
 0x26d   :  { %v512_v17 = vpop.permute.xlu1 %511  ;;  %v507_v18 = vpop.permute.xlu0 %506 }
 0x271   :  { %v534_v26 = vpop.permute.xlu0 %533  ;;  %v529_v27 = vpop.permute.xlu1 %528 }
 0x275   :  { %v544_v33 = vpop.permute.xlu0 %543  ;;  %v539_v41 = vpop.permute.xlu1 %538 }
 0x31d   :  { %v775_v47 = vpop.f32.mrf.mxu1 }
 0x31e   :  { %v461_v51 = vadd.f32 %v775_v47, %v387_v49 }
 0x31f   :  { %v455_v50 = vpop.f32.mrf.mxu1 }
 0x320   :  { %v456_v52 = vadd.f32 %v455_v50, %v382_v48 }
 0x322   :  { %v468_v53 = vadd.f32 %v461_v51, %v456_v52 }
 0x324   :  { %v469_v54 = vrot.slane %v468_v53, 4 }
 0x326   :  { %v470_v55 = vadd.f32 %v469_v54, %v468_v53 }
 0x328   :  { %v471_v56 = vrot.slane %v470_v55, 2 }
 0x32a   :  { %v472_v57 = vadd.f32 %v471_v56, %v470_v55 }
 0x32c   :  { %v473_v58 = vrot.slane %v472_v57, 1 }
 0x32e   :  { %v474_v59 = vadd.f32 %v473_v58, %v472_v57 }
 0x330   :  { %v475_v60 = vmul.f32 0.0625, %v474_v59 }
 0x332   :  { %v476_v61 = vsub.f32 %v456_v52, %v475_v60  ;;  %v477_v62 = vsub.f32 %v461_v51, %v475_v60 }
 0x334   :  { %v478_v63 = vmul.f32 %v476_v61, %v476_v61  ;;  %v479_v0 = vmul.f32 %v477_v62, %v477_v62 }
 0x336   :  { %v480_v1 = vadd.f32 %v479_v0, %v478_v63 }
 0x338   :  { %v481_v2 = vrot.slane %v480_v1, 4 }
 0x33a   :  { %v482_v3 = vadd.f32 %v481_v2, %v480_v1 }
 0x33c   :  { %v483_v4 = vrot.slane %v482_v3, 2 }
 0x33e   :  { %v484_v5 = vadd.f32 %v483_v4, %v482_v3 }
 0x340   :  { %v485_v6 = vrot.slane %v484_v5, 1 }
 0x342   :  { %v486_v7 = vadd.f32 %v485_v6, %v484_v5 }
 0x344   :  { %v487_v8 = vmul.f32 0.0625, %v486_v7 }
 0x346   :  { %v488_v9 = vadd.f32 1e-12, %v487_v8 }
 0x348   :  { %804 = vrsqrt.f32 %v488_v9 }
 0x355   :  { %v805_v12 = vpop.eup %804 }
 0x356   :  { %v490_v13 = vmul.f32 %v805_v12, %v476_v61  ;;  %v491_v14 = vmul.f32 %v805_v12, %v477_v62 }
 0x358   :  { %v503_v15 = vmul.f32 %v500_v10, %v491_v14  ;;  %v502_v16 = vmul.f32 %v495_v11, %v490_v13 }
 0x35a   :  { %v515_v19 = vadd.f32 %v512_v17, %v503_v15  ;;  %v514_v20 = vadd.f32 %v507_v18, %v502_v16 }
 0x35c   :  { %v517_v21 = vmax.f32 %v515_v19, 0.0  ;;  %v516_v22 = vmax.f32 %v514_v20, 0.0 }
 0x35e   :  { %776 = vmatprep.subr.mxu0 %v517_v21 }
 0x35f   :  { %777 = vmatpush3.msra.mxu0 %v517_v21 }
 0x360   :  { %778 = vmatprep.subr.mxu0 %v516_v22 }
 0x361   :  { %779 = vmatpush3.msra.mxu0 %v516_v22 }
 0x362   :  { %781 = vmatmul.mubr.msk.f32.vlgmr.msra.gmra.mxu0 %vm546_vm4, %v519_v23 }
 0x363   :  { %783 = vmatprep.mubr.msk.f32.mxu0 %vm546_vm4, %v520_v24 }
 0x366   :  { %784 = vmatmul.mubr.msk.f32.gmra.mxu0 %vm546_vm4, %v521_v25 }
 0x422   :  { %v782_v28 = vpop.f32.mrf.mxu0 }
 0x423   :  { %v631_v29 = vadd.f32 %v782_v28, %v534_v26 }
 0x424   :  { %v625_v30 = vpop.f32.mrf.mxu0 }
 0x425   :  { %v645_v31 = vadd.f32 %v631_v29, %v995_v37  ;;  %v626_v32 = vadd.f32 %v625_v30, %v529_v27 }
 0x426   :  { %v785_v34 = vpop.f32.mrf.mxu0 }
 0x427   :  { %649 = vst.msk [vmem:[#allocation2 + $0x8] sm:$0xff] %vm73_vm1, %v645_v31  ;;  %v644_v35 = vadd.f32 %v626_v32, %v993_v36  ;;  %v641_v38 = vadd.f32 %v785_v34, %v544_v33  ;;  %658 = vrot.lane.b32.xlu0 %v645_v31, %s828_s17 }
 0x428   :  { %v635_v42 = vpop.f32.mrf.mxu0 }
 0x429   :  { %648 = vst.msk [vmem:[#allocation2] sm:$0xff] %vm73_vm1, %v644_v35  ;;  %v647_v43 = vadd.f32 %v641_v38, %v1001_v40  ;;  %v636_v44 = vadd.f32 %v635_v42, %v539_v41  ;;  %656 = vrot.lane.b32.xlu1 %v644_v35, %s828_s17 }
 0x42b   :  { %651 = vst.msk [vmem:[#allocation2 + $0x18] sm:$0xff] %vm73_vm1, %v647_v43  ;;  %v646_v37 = vadd.f32 %v636_v44, %v999_v39  ;;  %662 = vrot.lane.b32.xlu0 %v647_v43, %s828_s17 }
 0x42d   :  { %650 = vst.msk [vmem:[#allocation2 + $0x10] sm:$0xff] %vm73_vm1, %v646_v37  ;;  %660 = vrot.lane.b32.xlu1 %v646_v37, %s828_s17 }
 0x499   :  { %v659_v36 = vpop.permute.xlu0 %658 }
 0x49a   :  { %670 = vst.msk [vmem:[#allocation2 + $0x28] sm:$0xff] %vm73_vm1, %v659_v36 }
 0x49b   :  { %v657_v45 = vpop.permute.xlu1 %656 }
 0x49c   :  { %669 = vst.msk [vmem:[#allocation2 + $0x20] sm:$0xff] %vm73_vm1, %v657_v45 }
 0x49d   :  { %v663_v40 = vpop.permute.xlu0 %662 }
 0x49e   :  { %672 = vst.msk [vmem:[#allocation2 + $0x38] sm:$0xff] %vm73_vm1, %v663_v40 }
 0x49f   :  { %v661_v46 = vpop.permute.xlu1 %660 }
 0x4a0   :  { %671 = vst.msk [vmem:[#allocation2 + $0x30] sm:$0xff] %vm73_vm1, %v661_v46 }
 0x4a1   :  { %817 = shalt.err (!%p814_p4)
}
 0x4a2   :  { %s839_s17 = smov 128  }
 0x4a3   :  { %684 = dma.vmem_to_hbm [thread:$0]  %s679_s20, 1024, %s1104_s14, [#allocation3], %s839_s17, %s839_s17, %s830_s2  }
 0x4a4   :  { %826 = dma.done.wait [#allocation3], 1024  }
 0x4a5   :  { %827 = vsyncadd [#allocation3], 4294966272 }
 0x4a6   :  { %688 = vsyncpa [#allocation3], 1 }

</bundles_post_ra>
